<compile_context>
chip_gen: v7x
topology: tpu7x:2x2x1
jax: 0.10.0
libtpu: 0.0.40
codegen_flags: <defaults>
</compile_context>

<pallas_src>
import functools

import jax
import jax.numpy as jnp
from jax.experimental import pallas as pl
from jax.experimental.pallas import tpu as pltpu

BN_EPS = 1e-5
GIN_EPS = 0.0          # GINConv default: eps=0, train_eps=False
LANE = 128             # feature dims padded to the TPU lane width
SUB = 16               # sublane padding multiple (bf16-friendly)
TM_MAX = 256           # target-row tile (mult of SUB); sized conservatively for v7x VMEM
TK_MAX = 1024          # source / K tile (mult of LANE); v5e/v6e can take larger tiles
NEG_INF = -1e30


def _round_up(x, m):
    return (x + m - 1) // m * m


def _pad2d(a, rows, cols):
    return jnp.pad(a, ((0, rows - a.shape[0]), (0, cols - a.shape[1])))


# ----------------------------- Pallas kernel ---------------------------------
def _gin_layer_kernel(adj_ref, x_ref, w1_ref, b1_ref, w2_ref, b2_ref,
                      out_ref, acc_ref, *, n_valid_out, final_relu,
                      final_log_softmax):
    k = pl.program_id(1)

    @pl.when(k == 0)
    def _init():
        acc_ref[...] = jnp.zeros_like(acc_ref)

    # GIN sum aggregation (self term already folded into adj diagonal): bf16 MXU, f32 acc.
    acc_ref[...] += jnp.dot(adj_ref[...], x_ref[...],
                            preferred_element_type=jnp.float32)

    @pl.when(k == pl.num_programs(1) - 1)
    def _finalize():
        h = acc_ref[...]
        # Linear1 with eval-mode BatchNorm1d pre-folded into w1/b1; then ReLU.
        # Dropout(p) is identity in eval mode.
        z = jnp.dot(h.astype(jnp.bfloat16), w1_ref[...],
                    preferred_element_type=jnp.float32) + b1_ref[...]
        z = jnp.maximum(z, 0.0)
        # Linear2
        z = jnp.dot(z.astype(jnp.bfloat16), w2_ref[...],
                    preferred_element_type=jnp.float32) + b2_ref[...]
        if final_relu:            # first GIN MLP ends in ReLU
            z = jnp.maximum(z, 0.0)
        if final_log_softmax:     # F.log_softmax(x, dim=-1) after the last layer
            # Mask the zero-padded output lanes before normalization.
            lane = jax.lax.broadcasted_iota(jnp.int32, z.shape, 1)
            z = jnp.where(lane < n_valid_out, z, NEG_INF)
            m = jnp.max(z, axis=-1, keepdims=True)
            e = jnp.exp(z - m)
            z = (z - m) - jnp.log(jnp.sum(e, axis=-1, keepdims=True))
        out_ref[...] = z.astype(out_ref.dtype)


def gin_layer(adj, x, lp, *, final_relu, final_log_softmax,
              tm_max=TM_MAX, tk_max=TK_MAX):
    """One GINConv + MLP layer as a single tiled pallas_call.

    adj: [n_t, n_s] f32 dense adjacency with (1+eps) already added on the diagonal.
    x:   [n_s, f_in] source-node activations (f_in may already be lane-padded).
    lp:  prepared layer params (BN folded, lane padded, bf16 weight matrices).
    Returns [n_t, f_out_padded] f32.
    """
    n_t, n_s = adj.shape
    f_in_p, h_p = lp["w1"].shape
    f_out_p = lp["w2"].shape[1]

    # Row / K padding and tile selection.
    n_t_p = _round_up(n_t, SUB)
    tm = n_t_p if n_t_p <= tm_max else tm_max
    n_t_p = _round_up(n_t_p, tm)
    n_s_p = _round_up(n_s, LANE)
    tk = n_s_p if n_s_p <= tk_max else tk_max
    n_s_p = _round_up(n_s_p, tk)

    adj_p = _pad2d(adj, n_t_p, n_s_p).astype(jnp.bfloat16)   # small counts: exact in bf16
    x_p = _pad2d(x, n_s_p, f_in_p).astype(jnp.bfloat16)

    kernel = functools.partial(
        _gin_layer_kernel,
        n_valid_out=lp["f_out"],
        final_relu=final_relu,
        final_log_softmax=final_log_softmax)

    out = pl.pallas_call(
        kernel,
        out_shape=jax.ShapeDtypeStruct((n_t_p, f_out_p), jnp.float32),
        grid_spec=pltpu.PrefetchScalarGridSpec(
            num_scalar_prefetch=0,
            grid=(n_t_p // tm, n_s_p // tk),
            in_specs=[
                pl.BlockSpec((tm, tk), lambda i, k: (i, k)),        # adjacency tile
                pl.BlockSpec((tk, f_in_p), lambda i, k: (k, 0)),    # source features
                pl.BlockSpec((f_in_p, h_p), lambda i, k: (0, 0)),   # w1 (BN folded)
                pl.BlockSpec((1, h_p), lambda i, k: (0, 0)),        # b1 (BN folded)
                pl.BlockSpec((h_p, f_out_p), lambda i, k: (0, 0)),  # w2
                pl.BlockSpec((1, f_out_p), lambda i, k: (0, 0)),    # b2
            ],
            out_specs=pl.BlockSpec((tm, f_out_p), lambda i, k: (i, 0)),
            scratch_shapes=[pltpu.VMEM((tm, f_in_p), jnp.float32)],
        ),
        compiler_params=pltpu.CompilerParams(
            dimension_semantics=("parallel", "arbitrary")),
    )(adj_p, x_p, lp["w1"], lp["b1"], lp["w2"], lp["b2"])
    return out[:n_t]


# ------------------------------- glue (JAX) -----------------------------------
def dense_adjacency(edge_index, n_target, n_source):
    """edge_index: [2, E] with row 0 = src (in source set), row 1 = dst (in target set)."""
    src, dst = edge_index[0], edge_index[1]
    a = jnp.zeros((n_target, n_source), jnp.float32)
    return a.at[dst, src].add(1.0)


def init_linear(key, fan_in, fan_out):
    kw, kb = jax.random.split(key)
    bound = 1.0 / (fan_in ** 0.5)
    w = jax.random.uniform(kw, (fan_in, fan_out), jnp.float32, -bound, bound)
    b = jax.random.uniform(kb, (1, fan_out), jnp.float32, -bound, bound)
    return w, b


def init_gin_params(key, num_node_features, hidden_size, out_channels):
    """Two GINConv MLPs with PyTorch-default BatchNorm1d buffers/affine params."""
    k1, k2, k3, k4 = jax.random.split(key, 4)
    dims = [(num_node_features, hidden_size, hidden_size),
            (hidden_size, hidden_size, out_channels)]
    keys = [(k1, k2), (k3, k4)]
    params = []
    for (f_in, h, f_out), (ka, kb) in zip(dims, keys):
        w1, b1 = init_linear(ka, f_in, h)
        w2, b2 = init_linear(kb, h, f_out)
        params.append(dict(
            w1=w1, b1=b1,
            gamma=jnp.ones((1, h), jnp.float32),
            beta=jnp.zeros((1, h), jnp.float32),
            mean=jnp.zeros((1, h), jnp.float32),
            var=jnp.ones((1, h), jnp.float32),
            w2=w2, b2=b2,
        ))
    return params


def prepare_gin_params(params_list):
    """Fold eval-mode BatchNorm into Linear1, zero-pad feature dims to the 128-lane
    width, and cast weight matrices to bf16 for the MXU (biases stay f32)."""
    prepped = []
    for p in params_list:
        f_in, h = p["w1"].shape
        f_out = p["w2"].shape[1]
        scale = p["gamma"] * jax.lax.rsqrt(p["var"] + BN_EPS)          # (1, h)
        w1f = p["w1"] * scale
        b1f = (p["b1"] - p["mean"]) * scale + p["beta"]
        f_in_p = _round_up(f_in, LANE)
        h_p = _round_up(h, LANE)
        f_out_p = _round_up(f_out, LANE)
        prepped.append(dict(
            w1=_pad2d(w1f, f_in_p, h_p).astype(jnp.bfloat16),
            b1=_pad2d(b1f, 1, h_p),
            w2=_pad2d(p["w2"], h_p, f_out_p).astype(jnp.bfloat16),
            b2=_pad2d(p["b2"], 1, f_out_p),
            f_out=f_out,
        ))
    return prepped


def gin_forward(x_batch, adjs, params_list):
    """adjs: list of (dense_adj [n_t, n_s], size=(n_s, n_t)) — mirrors the PyG adjs loop."""
    prepped = prepare_gin_params(params_list)
    num_layers = len(adjs)
    x = x_batch
    for i, (adj, size) in enumerate(adjs):
        n_t = size[1]
        # Fold the (1+eps)*x_target self term into the adjacency diagonal
        # (targets are the first size[1] source nodes in PyG NeighborSampler ordering).
        diag = jnp.arange(n_t)
        adj_sl = adj.at[diag, diag].add(1.0 + GIN_EPS)
        x = gin_layer(adj_sl, x, prepped[i],
                      final_relu=(i == 0),
                      final_log_softmax=(i == num_layers - 1))
        # NOTE: for tiny batches both layers could be fused into one pallas_call, but the
        # tiled per-layer form is kept so the design scales to real Reddit batches.
    return x[:, :prepped[-1]["f_out"]]


def gin_forward_ref(x_batch, adjs, params_list):
    """Pure-JAX fp32 reference of the PyTorch module semantics (eval mode)."""
    hp = jax.lax.Precision.HIGHEST
    x = x_batch
    for i, (adj, size) in enumerate(adjs):
        xt = x[: size[1]]
        h = jnp.dot(adj, x, precision=hp) + (1.0 + GIN_EPS) * xt
        p = params_list[i]
        z = jnp.dot(h, p["w1"], precision=hp) + p["b1"]
        z = (z - p["mean"]) / jnp.sqrt(p["var"] + BN_EPS) * p["gamma"] + p["beta"]
        z = jnp.maximum(z, 0.0)
        z = jnp.dot(z, p["w2"], precision=hp) + p["b2"]
        if i == 0:
            z = jnp.maximum(z, 0.0)
        x = z
    return jax.nn.log_softmax(x, axis=-1)


# ---------------------------------- main --------------------------------------
if __name__ == "__main__":
    key = jax.random.PRNGKey(0)
    k_x, k_e0, k_e1, k_p = jax.random.split(key, 4)

    # Small synthetic neighbor-sampled subgraph (stand-in for NeighborSampler on Reddit).
    num_node_features, hidden_size, out_channels = 16, 32, 8
    n0, n1, n2 = 64, 16, 8          # sampled node counts per hop
    num_samples = [10, 5]           # neighbors per target per layer

    x_batch = jax.random.normal(k_x, (n0, num_node_features), jnp.float32)

    # Layer 0: edges from n0 sources into n1 targets (10 neighbors each).
    src0 = jax.random.randint(k_e0, (n1 * num_samples[0],), 0, n0)
    dst0 = jnp.repeat(jnp.arange(n1), num_samples[0])
    adj0 = dense_adjacency(jnp.stack([src0, dst0]), n1, n0)

    # Layer 1: edges from n1 sources into n2 targets (5 neighbors each).
    src1 = jax.random.randint(k_e1, (n2 * num_samples[1],), 0, n1)
    dst1 = jnp.repeat(jnp.arange(n2), num_samples[1])
    adj1 = dense_adjacency(jnp.stack([src1, dst1]), n2, n1)

    adjs = [(adj0, (n0, n1)), (adj1, (n1, n2))]
    params = init_gin_params(k_p, num_node_features, hidden_size, out_channels)

    out = gin_forward(x_batch, adjs, params)
    out = jax.block_until_ready(out)
    assert out.shape == (n2, out_channels), out.shape

    # Structural check: each log_softmax row must normalize (exact in f32 regardless of
    # the bf16 matmul inputs) -> verifies the padded-lane masking is correct.
    m = jnp.max(out, axis=-1, keepdims=True)
    lse = m[:, 0] + jnp.log(jnp.sum(jnp.exp(out - m), axis=-1))
    assert jnp.max(jnp.abs(lse)) < 1e-4, f"logsumexp not ~0: {lse}"

    # Numerical check vs a pure-f32 reference of the module semantics. The kernel feeds
    # bf16 operands to the MXU (f32 accumulation), so compare at bf16-appropriate tolerance.
    ref = gin_forward_ref(x_batch, adjs, params)
    err = jnp.max(jnp.abs(out - ref))
    assert err < 5e-2, f"max abs err vs f32 reference: {err}"
    print("KERNEL_OK")
</pallas_src>

<mosaic_0001>
module attributes {stable_mosaic.version = 11 : i64} {
  func.func @_gin_layer_kernel(%arg0: i32, %arg1: i32, %arg2: memref<16x128xbf16, #tpu.memory_space<vmem>>, %arg3: memref<128x128xbf16, #tpu.memory_space<vmem>>, %arg4: memref<128x128xbf16, #tpu.memory_space<vmem>>, %arg5: memref<1x128xf32, #tpu.memory_space<vmem>>, %arg6: memref<128x128xbf16, #tpu.memory_space<vmem>>, %arg7: memref<1x128xf32, #tpu.memory_space<vmem>>, %arg8: memref<16x128xf32, #tpu.memory_space<vmem>>, %arg9: memref<16x128xf32, #tpu.memory_space<vmem>>) attributes {dimension_semantics = [#tpu.dimension_semantics<parallel>, #tpu.dimension_semantics<arbitrary>], iteration_bounds = array<i64: 1, 1>, scalar_prefetch = 0 : i64, scratch_operands = 1 : i64, tpu.core_type = #tpu.core_type<tc>, window_params = [{transform_indices = @transform_0, window_bounds = array<i64: 16, 128>}, {transform_indices = @transform_1, window_bounds = array<i64: 128, 128>}, {pipeline_mode = #tpu.pipeline_mode<synchronous>, transform_indices = @transform_2, window_bounds = array<i64: 128, 128>}, {pipeline_mode = #tpu.pipeline_mode<synchronous>, transform_indices = @transform_3, window_bounds = array<i64: 1, 128>}, {pipeline_mode = #tpu.pipeline_mode<synchronous>, transform_indices = @transform_4, window_bounds = array<i64: 128, 128>}, {pipeline_mode = #tpu.pipeline_mode<synchronous>, transform_indices = @transform_5, window_bounds = array<i64: 1, 128>}, {transform_indices = @transform_6, window_bounds = array<i64: 16, 128>}]} {
    %c0_i32 = arith.constant 0 : i32
    %0 = arith.cmpi eq, %arg1, %c0_i32 : i32
    %1 = arith.extui %0 : i1 to i32
    %c0_i32_0 = arith.constant 0 : i32
    %2 = arith.cmpi ne, %1, %c0_i32_0 : i32
    scf.if %2 {
      %cst_10 = arith.constant 0.000000e+00 : f32
      %12 = vector.broadcast %cst_10 : f32 to vector<16x128xf32>
      %c0_11 = arith.constant 0 : index
      %c0_12 = arith.constant 0 : index
      %13 = vector.load %arg9[%c0_11, %c0_12] : memref<16x128xf32, #tpu.memory_space<vmem>>, vector<16x128xf32>
      tpu.vector_store %arg9[%c0_11, %c0_12], %12 {strides = array<i32>} : memref<16x128xf32, #tpu.memory_space<vmem>>, vector<16x128xf32>,
    } else {
    }
    %c0 = arith.constant 0 : index
    %c0_1 = arith.constant 0 : index
    %3 = vector.load %arg9[%c0, %c0_1] : memref<16x128xf32, #tpu.memory_space<vmem>>, vector<16x128xf32>
    %c0_2 = arith.constant 0 : index
    %c0_3 = arith.constant 0 : index
    %4 = vector.load %arg2[%c0_2, %c0_3] : memref<16x128xbf16, #tpu.memory_space<vmem>>, vector<16x128xbf16>
    %c0_4 = arith.constant 0 : index
    %c0_5 = arith.constant 0 : index
    %5 = vector.load %arg3[%c0_4, %c0_5] : memref<128x128xbf16, #tpu.memory_space<vmem>>, vector<128x128xbf16>
    %cst = arith.constant dense<0.000000e+00> : vector<16x128xf32>
    %6 = tpu.matmul %4, %5, %cst {dimension_numbers = #tpu.dot_dimension_numbers<[1], [0], [0], [1], [0, 0, 1, 1], [], []>} : vector<16x128xbf16>, vector<128x128xbf16>, vector<16x128xf32> -> vector<16x128xf32>
    %7 = arith.addf %3, %6 : vector<16x128xf32>
    %c0_6 = arith.constant 0 : index
    %c0_7 = arith.constant 0 : index
    %8 = vector.load %arg9[%c0_6, %c0_7] : memref<16x128xf32, #tpu.memory_space<vmem>>, vector<16x128xf32>
    tpu.vector_store %arg9[%c0_6, %c0_7], %7 {strides = array<i32>} : memref<16x128xf32, #tpu.memory_space<vmem>>, vector<16x128xf32>,
    %c0_i32_8 = arith.constant 0 : i32
    %9 = arith.cmpi eq, %arg1, %c0_i32_8 : i32
    %10 = arith.extui %9 : i1 to i32
    %c0_i32_9 = arith.constant 0 : i32
    %11 = arith.cmpi ne, %10, %c0_i32_9 : i32
    scf.if %11 {
      %c0_10 = arith.constant 0 : index
      %c0_11 = arith.constant 0 : index
      %12 = vector.load %arg9[%c0_10, %c0_11] : memref<16x128xf32, #tpu.memory_space<vmem>>, vector<16x128xf32>
      %13 = arith.truncf %12 : vector<16x128xf32> to vector<16x128xbf16>
      %c0_12 = arith.constant 0 : index
      %c0_13 = arith.constant 0 : index
      %14 = vector.load %arg4[%c0_12, %c0_13] : memref<128x128xbf16, #tpu.memory_space<vmem>>, vector<128x128xbf16>
      %cst_14 = arith.constant dense<0.000000e+00> : vector<16x128xf32>
      %15 = tpu.matmul %13, %14, %cst_14 {dimension_numbers = #tpu.dot_dimension_numbers<[1], [0], [0], [1], [0, 0, 1, 1], [], []>} : vector<16x128xbf16>, vector<128x128xbf16>, vector<16x128xf32> -> vector<16x128xf32>
      %c0_15 = arith.constant 0 : index
      %c0_16 = arith.constant 0 : index
      %16 = vector.load %arg5[%c0_15, %c0_16] : memref<1x128xf32, #tpu.memory_space<vmem>>, vector<1x128xf32>
      %17 = vector.broadcast %16 : vector<1x128xf32> to vector<16x128xf32>
      %18 = arith.addf %15, %17 : vector<16x128xf32>
      %cst_17 = arith.constant 0.000000e+00 : f32
      %19 = vector.broadcast %cst_17 : f32 to vector<16x128xf32>
      %20 = arith.maximumf %18, %19 : vector<16x128xf32>
      %21 = arith.truncf %20 : vector<16x128xf32> to vector<16x128xbf16>
      %c0_18 = arith.constant 0 : index
      %c0_19 = arith.constant 0 : index
      %22 = vector.load %arg6[%c0_18, %c0_19] : memref<128x128xbf16, #tpu.memory_space<vmem>>, vector<128x128xbf16>
      %cst_20 = arith.constant dense<0.000000e+00> : vector<16x128xf32>
      %23 = tpu.matmul %21, %22, %cst_20 {dimension_numbers = #tpu.dot_dimension_numbers<[1], [0], [0], [1], [0, 0, 1, 1], [], []>} : vector<16x128xbf16>, vector<128x128xbf16>, vector<16x128xf32> -> vector<16x128xf32>
      %c0_21 = arith.constant 0 : index
      %c0_22 = arith.constant 0 : index
      %24 = vector.load %arg7[%c0_21, %c0_22] : memref<1x128xf32, #tpu.memory_space<vmem>>, vector<1x128xf32>
      %25 = vector.broadcast %24 : vector<1x128xf32> to vector<16x128xf32>
      %26 = arith.addf %23, %25 : vector<16x128xf32>
      %cst_23 = arith.constant 0.000000e+00 : f32
      %27 = vector.broadcast %cst_23 : f32 to vector<16x128xf32>
      %28 = arith.maximumf %26, %27 : vector<16x128xf32>
      %c0_24 = arith.constant 0 : index
      %c0_25 = arith.constant 0 : index
      %29 = vector.load %arg8[%c0_24, %c0_25] : memref<16x128xf32, #tpu.memory_space<vmem>>, vector<16x128xf32>
      tpu.vector_store %arg8[%c0_24, %c0_25], %28 {strides = array<i32>} : memref<16x128xf32, #tpu.memory_space<vmem>>, vector<16x128xf32>,
    } else {
    }
    return
  }
  func.func @transform_0(%arg0: i32, %arg1: i32) -> (i32, i32) {
    %c0_i32 = arith.constant 0 : i32
    return %arg0, %arg1 : i32, i32
  }
  func.func @transform_1(%arg0: i32, %arg1: i32) -> (i32, i32) {
    %c0_i32 = arith.constant 0 : i32
    %c0_i32_0 = arith.constant 0 : i32
    return %arg1, %c0_i32 : i32, i32
  }
  func.func @transform_2(%arg0: i32, %arg1: i32) -> (i32, i32) {
    %c0_i32 = arith.constant 0 : i32
    %c0_i32_0 = arith.constant 0 : i32
    %c0_i32_1 = arith.constant 0 : i32
    return %c0_i32, %c0_i32_0 : i32, i32
  }
  func.func @transform_3(%arg0: i32, %arg1: i32) -> (i32, i32) {
    %c0_i32 = arith.constant 0 : i32
    %c0_i32_0 = arith.constant 0 : i32
    %c0_i32_1 = arith.constant 0 : i32
    return %c0_i32, %c0_i32_0 : i32, i32
  }
  func.func @transform_4(%arg0: i32, %arg1: i32) -> (i32, i32) {
    %c0_i32 = arith.constant 0 : i32
    %c0_i32_0 = arith.constant 0 : i32
    %c0_i32_1 = arith.constant 0 : i32
    return %c0_i32, %c0_i32_0 : i32, i32
  }
  func.func @transform_5(%arg0: i32, %arg1: i32) -> (i32, i32) {
    %c0_i32 = arith.constant 0 : i32
    %c0_i32_0 = arith.constant 0 : i32
    %c0_i32_1 = arith.constant 0 : i32
    return %c0_i32, %c0_i32_0 : i32, i32
  }
  func.func @transform_6(%arg0: i32, %arg1: i32) -> (i32, i32) {
    %c0_i32 = arith.constant 0 : i32
    %c0_i32_0 = arith.constant 0 : i32
    return %arg0, %c0_i32 : i32, i32
  }
}

</mosaic_0001>

<bundles_post_ra>
// kernel: tpu_custom_call.1
= control target key start
LH: loop header
LB: loop body
LE: loop exit
PB: predicated region body
PF: predicated region fallthrough
CT: control target
= control target key end

     0   :  { %11 = vsyncpa [#allocation4], 0  ;;  %s897_s0 = inlined_call_operand.hbm [shape: bf16[16,128], index: 0, kind: input, shape index: {}]   ;;  %s898_s1 = inlined_call_operand.hbm [shape: bf16[128,128], index: 1, kind: input, shape index: {}]   ;;  %s899_s2 = inlined_call_operand.hbm [shape: bf16[128,128], index: 2, kind: input, shape index: {}]   ;;  %s900_s3 = inlined_call_operand.vmem [shape: f32[1,128], index: 3, kind: input, shape index: {}]   ;;  %s901_s4 = inlined_call_operand.hbm [shape: bf16[128,128], index: 4, kind: input, shape index: {}]   ;;  %s902_s5 = inlined_call_operand.vmem [shape: f32[1,128], index: 5, kind: input, shape index: {}]   ;;  %s903_s6 = inlined_call_operand.hbm [shape: f32[16,128], index: 6, kind: output, shape index: {}]  }
   0x1   :  { %12 = vsyncpa [#allocation7], 0 }
   0x2   :  { %13 = vsyncpa [#allocation10], 0 }
   0x3   :  { %14 = vsyncpa [#allocation5], 0  ;;  %s729_s21 = smov [#allocation6]   ;;  %s730_s23 = smov [#allocation3]  }
   0x4   :  { %s32_s22 = sshll.u32 %s729_s21, 4  ;;  %s20_s24 = sshll.u32 %s730_s23, 4  ;;  %s33_s22 = int_to_ptr.vmem [resolvable:$true] %s32_s22  ;;  %s775_s24 = int_to_ptr.vmem [resolvable:$true] %s20_s24 }
   0x5   :  { %s611_s27 = scalar_lea.hbm %s898_s1, 1024 }
   0x6   :  { %p612_p0 = scmp.ne.s32.totalorder %s898_s1, %s611_s27  ;;  %p615_p1 = scmp.lt.u32.totalorder %s611_s27, %s898_s1 }
   0x8   :  { %p617_p2 = pnand %p615_p1, %p612_p0 }
   0xa   :  { %620 = shalt.err (!%p617_p2)
}
   0xb   :  { %s621_s8 = scalar_lea.vmem %s33_s22, 1024  ;;  %p626_p4 = scmp.lt.s32.totalorder %s33_s22, %s33_s22 }
   0xc   :  { %p622_p3 = scmp.ne.s32.totalorder %s33_s22, %s621_s8  ;;  %p627_p5 = scmp.lt.s32.totalorder %s621_s8, %s621_s8 }
   0xe   :  { %p628_p6 = por %p627_p5, %p626_p4 }
  0x10   :  { %p629_p7 = pnand %p628_p6, %p622_p3 }
  0x12   :  { %632 = shalt.err (!%p629_p7)
}
  0x13   :  { %s731_s9 = smov 64   ;;  %s732_s10 = smov 4  }
  0x14   :  { %38 = dma.hbm_to_vmem [thread:$0]  %s898_s1, 1024, %s33_s22, [#allocation7], %s731_s9, %s731_s9, %s732_s10  }
  0x15   :  { %s633_s15 = scalar_lea.hbm %s897_s0, 128 }
  0x16   :  { %p634_p8 = scmp.ne.s32.totalorder %s897_s0, %s633_s15  ;;  %p637_p9 = scmp.lt.u32.totalorder %s633_s15, %s897_s0 }
  0x18   :  { %p639_p10 = pnand %p637_p9, %p634_p8 }
  0x1a   :  { %642 = shalt.err (!%p639_p10)
}
  0x1b   :  { %s643_s20 = scalar_lea.vmem %s775_s24, 128  ;;  %p648_p12 = scmp.lt.s32.totalorder %s775_s24, %s775_s24 }
  0x1c   :  { %p644_p11 = scmp.ne.s32.totalorder %s775_s24, %s643_s20  ;;  %p649_p13 = scmp.lt.s32.totalorder %s643_s20, %s643_s20 }
  0x1e   :  { %p650_p0 = por %p649_p13, %p648_p12 }
  0x20   :  { %p651_p1 = pnand %p650_p0, %p644_p11 }
  0x22   :  { %654 = shalt.err (!%p651_p1)
}
  0x23   :  { %26 = dma.hbm_to_vmem [thread:$0]  %s897_s0, 128, %s775_s24, [#allocation4], %s731_s9, %s731_s9, %s732_s10  }
  0x24   :  { %s733_s22 = smov [#allocation8]   ;;  %s734_s25 = smov [#allocation9]  }
  0x25   :  { %s44_s23 = sshll.u32 %s733_s22, 4  ;;  %s58_s26 = sshll.u32 %s734_s25, 4  ;;  %s45_s23 = int_to_ptr.vmem [resolvable:$true] %s44_s23  ;;  %s812_s26 = int_to_ptr.vmem [resolvable:$true] %s58_s26 }
  0x26   :  { %s655_s29 = scalar_lea.hbm %s899_s2, 1024 }
  0x27   :  { %p656_p2 = scmp.ne.s32.totalorder %s899_s2, %s655_s29  ;;  %p659_p3 = scmp.lt.u32.totalorder %s655_s29, %s899_s2 }
  0x29   :  { %p661_p4 = pnand %p659_p3, %p656_p2 }
  0x2b   :  { %664 = shalt.err (!%p661_p4)
}
  0x2c   :  { %s665_s0 = scalar_lea.vmem %s45_s23, 1024  ;;  %p670_p6 = scmp.lt.s32.totalorder %s45_s23, %s45_s23 }
  0x2d   :  { %p666_p5 = scmp.ne.s32.totalorder %s45_s23, %s665_s0  ;;  %p671_p7 = scmp.lt.s32.totalorder %s665_s0, %s665_s0 }
  0x2f   :  { %p672_p8 = por %p671_p7, %p670_p6 }
  0x31   :  { %p673_p9 = pnand %p672_p8, %p666_p5 }
  0x33   :  { %676 = shalt.err (!%p673_p9)
}
  0x34   :  { %50 = dma.hbm_to_vmem [thread:$0]  %s899_s2, 1024, %s45_s23, [#allocation7], %s731_s9, %s731_s9, %s732_s10  }
  0x35   :  { %s677_s15 = scalar_lea.hbm %s901_s4, 1024 }
  0x36   :  { %p678_p10 = scmp.ne.s32.totalorder %s901_s4, %s677_s15  ;;  %p681_p11 = scmp.lt.u32.totalorder %s677_s15, %s901_s4 }
  0x38   :  { %p683_p12 = pnand %p681_p11, %p678_p10 }
  0x3a   :  { %686 = shalt.err (!%p683_p12)
}
  0x3b   :  { %s687_s20 = scalar_lea.vmem %s812_s26, 1024  ;;  %p692_p0 = scmp.lt.s32.totalorder %s812_s26, %s812_s26 }
  0x3c   :  { %p688_p13 = scmp.ne.s32.totalorder %s812_s26, %s687_s20  ;;  %p693_p1 = scmp.lt.s32.totalorder %s687_s20, %s687_s20 }
  0x3e   :  { %p694_p2 = por %p693_p1, %p692_p0 }
  0x40   :  { %p695_p3 = pnand %p694_p2, %p688_p13 }
  0x42   :  { %698 = shalt.err (!%p695_p3)
}
  0x43   :  { %64 = dma.hbm_to_vmem [thread:$0]  %s901_s4, 1024, %s812_s26, [#allocation10], %s731_s9, %s731_s9, %s732_s10  }
  0x44   :  { %721 = dma.done.wait [#allocation4], 128  }
  0x45   :  { %722 = vsyncadd [#allocation4], 4294967168 }
  0x46   :  { %723 = dma.done.wait [#allocation7], 2048  }
  0x47   :  { %724 = vsyncadd [#allocation7], 4294965248 }
  0x48   :  { %725 = dma.done.wait [#allocation10], 1024  }
  0x49   :  { %726 = vsyncadd [#allocation10], 4294966272  ;;  %v735_v0 = vmov 0.0   ;;  %vm736_vm0 = vmmov 0   ;;  %v586_v1 = vld [vmem:[#allocation6] sm:$0xff]   ;;  %v587_v2 = vld [vmem:[#allocation6 + $0x8] sm:$0xff]  }
  0x4a   :  { %515 = vmatprep.subr.bf16.mxu0 %v735_v0  ;;  %531 = vmatprep.mubr.msk.bf16.mxu0 %vm736_vm0, %v735_v0  ;;  %v588_v3 = vld [vmem:[#allocation6 + $0x10] sm:$0xff]   ;;  %v595_v4 = vld [vmem:[#allocation8] sm:$0xff]   ;;  %v589_v5 = vld [vmem:[#allocation6 + $0x18] sm:$0xff]   ;;  %s737_s22 = smov [#allocation11]  }
  0x4b   :  { %535 = vmatprep.subr.bf16.mxu1 %v735_v0  ;;  %551 = vmatprep.mubr.msk.bf16.mxu1 %vm736_vm0, %v735_v0  ;;  %v596_v6 = vld [vmem:[#allocation8 + $0x8] sm:$0xff]   ;;  %v590_v7 = vld [vmem:[#allocation6 + $0x20] sm:$0xff]   ;;  %v597_v8 = vld [vmem:[#allocation8 + $0x10] sm:$0xff]   ;;  %s447_s23 = sshll.u32 %s737_s22, 4  ;;  %s448_s23 = int_to_ptr.vmem [resolvable:$true] %s447_s23 }
  0x4c   :  { %516 = vmatpush3.bf16.msra.mxu0 %v586_v1  ;;  %536 = vmatpush3.bf16.msra.mxu1 %v595_v4  ;;  %v591_v9 = vld [vmem:[#allocation6 + $0x28] sm:$0xff]   ;;  %v598_v10 = vld [vmem:[#allocation8 + $0x18] sm:$0xff]   ;;  %v592_v11 = vld [vmem:[#allocation6 + $0x30] sm:$0xff]   ;;  %p704_p5 = scmp.lt.s32.totalorder %s448_s23, %s448_s23 }
  0x4d   :  { %517 = vmatprep.subr.bf16.mxu0 %v735_v0  ;;  %537 = vmatprep.subr.bf16.mxu1 %v735_v0  ;;  %v599_v12 = vld [vmem:[#allocation8 + $0x20] sm:$0xff]   ;;  %v593_v13 = vld [vmem:[#allocation6 + $0x38] sm:$0xff]   ;;  %v600_v14 = vld [vmem:[#allocation8 + $0x28] sm:$0xff]  }
  0x4e   :  { %v594_v15 = vld [vmem:[#allocation3] sm:$0xff]   ;;  %v601_v16 = vld [vmem:[#allocation8 + $0x30] sm:$0xff]   ;;  %v603_v18 = vld [vmem:[#allocation9] sm:$0xff]  }
  0x4f   :  { %v602_v17 = vld [vmem:[#allocation8 + $0x38] sm:$0xff]   ;;  %v604_v19 = vld [vmem:[#allocation9 + $0x8] sm:$0xff]   ;;  %v605_v20 = vld [vmem:[#allocation9 + $0x10] sm:$0xff]  }
  0x50   :  { %518 = vmatpush3.bf16.msra.mxu0 %v587_v2  ;;  %538 = vmatpush3.bf16.msra.mxu1 %v596_v6  ;;  %v606_v21 = vld [vmem:[#allocation9 + $0x18] sm:$0xff]   ;;  %v607_v22 = vld [vmem:[#allocation9 + $0x20] sm:$0xff]   ;;  %v608_v23 = vld [vmem:[#allocation9 + $0x28] sm:$0xff]  }
  0x51   :  { %519 = vmatprep.subr.bf16.mxu0 %v735_v0  ;;  %539 = vmatprep.subr.bf16.mxu1 %v735_v0  ;;  %v609_v29 = vld [vmem:[#allocation9 + $0x30] sm:$0xff]   ;;  %v610_v30 = vld [vmem:[#allocation9 + $0x38] sm:$0xff]  }
  0x52   :  { %v470_v31 = vld [vmem:[%s900_s3] ss:$0 sm:$0xff]  ;;  %s699_s3 = scalar_lea.vmem %s448_s23, 256 }
  0x53   :  { %v479_v41 = vld [vmem:[%s902_s5] ss:$0 sm:$0xff]  ;;  %p700_p4 = scmp.ne.s32.totalorder %s448_s23, %s699_s3  ;;  %p705_p6 = scmp.lt.s32.totalorder %s699_s3, %s699_s3 }
  0x54   :  { %520 = vmatpush3.bf16.msra.mxu0 %v588_v3  ;;  %540 = vmatpush3.bf16.msra.mxu1 %v597_v8 }
  0x55   :  { %521 = vmatprep.subr.bf16.mxu0 %v735_v0  ;;  %541 = vmatprep.subr.bf16.mxu1 %v735_v0  ;;  %p706_p7 = por %p705_p6, %p704_p5 }
  0x57   :  { %p707_p8 = pnand %p706_p7, %p700_p4 }
  0x58   :  { %522 = vmatpush3.bf16.msra.mxu0 %v589_v5  ;;  %542 = vmatpush3.bf16.msra.mxu1 %v598_v10 }
  0x59   :  { %523 = vmatprep.subr.bf16.mxu0 %v735_v0  ;;  %543 = vmatprep.subr.bf16.mxu1 %v735_v0 }
  0x5c   :  { %524 = vmatpush3.bf16.msra.mxu0 %v590_v7  ;;  %544 = vmatpush3.bf16.msra.mxu1 %v599_v12 }
  0x5d   :  { %525 = vmatprep.subr.bf16.mxu0 %v735_v0  ;;  %545 = vmatprep.subr.bf16.mxu1 %v735_v0 }
  0x60   :  { %526 = vmatpush3.bf16.msra.mxu0 %v591_v9  ;;  %546 = vmatpush3.bf16.msra.mxu1 %v600_v14 }
  0x61   :  { %527 = vmatprep.subr.bf16.mxu0 %v735_v0  ;;  %547 = vmatprep.subr.bf16.mxu1 %v735_v0 }
  0x64   :  { %528 = vmatpush3.bf16.msra.mxu0 %v592_v11  ;;  %548 = vmatpush3.bf16.msra.mxu1 %v601_v16 }
  0x65   :  { %529 = vmatprep.subr.bf16.mxu0 %v735_v0  ;;  %549 = vmatprep.subr.bf16.mxu1 %v735_v0 }
  0x68   :  { %530 = vmatpush3.bf16.msra.mxu0 %v593_v13  ;;  %550 = vmatpush3.bf16.msra.mxu1 %v602_v17 }
  0x69   :  { %555 = vmatprep.subr.bf16.mxu0 %v735_v0 }
  0x6b   :  { %532 = vmatmul.mubr.bf16.vlgmr.msra.gmra.mrb[0].mxu0 %v594_v15 }
  0x6c   :  { %571 = vmatprep.mubr.msk.bf16.mxu0 %vm736_vm0, %v735_v0  ;;  %556 = vmatpush3.bf16.msra.mxu0 %v603_v18 }
  0x6d   :  { %557 = vmatprep.subr.bf16.mxu0 %v735_v0 }
  0x70   :  { %558 = vmatpush3.bf16.msra.mxu0 %v604_v19 }
  0x71   :  { %559 = vmatprep.subr.bf16.mxu0 %v735_v0 }
  0x74   :  { %560 = vmatpush3.bf16.msra.mxu0 %v605_v20 }
  0x75   :  { %561 = vmatprep.subr.bf16.mxu0 %v735_v0 }
  0x78   :  { %562 = vmatpush3.bf16.msra.mxu0 %v606_v21 }
  0x79   :  { %563 = vmatprep.subr.bf16.mxu0 %v735_v0 }
  0x7c   :  { %564 = vmatpush3.bf16.msra.mxu0 %v607_v22 }
  0x7d   :  { %565 = vmatprep.subr.bf16.mxu0 %v735_v0 }
  0x80   :  { %566 = vmatpush3.bf16.msra.mxu0 %v608_v23 }
  0x81   :  { %567 = vmatprep.subr.bf16.mxu0 %v735_v0 }
  0x84   :  { %568 = vmatpush3.bf16.msra.mxu0 %v609_v29 }
  0x85   :  { %569 = vmatprep.subr.bf16.mxu0 %v735_v0 }
  0x88   :  { %570 = vmatpush3.bf16.msra.mxu0 %v610_v30 }
 0x13e   :  { %v194_v24 = vpop.f32.mrb[0].mxu0 }
 0x13f   :  { %v533_v25 = vpop.f32.mrb[1].mxu0 }
 0x140   :  { %v197_v26 = vpop.f32.mrb[2].mxu0 }
 0x141   :  { %v210_v27 = vpack.c.bf16 %v197_v26, %v194_v24  ;;  %v534_v28 = vpop.f32.mrb[3].mxu0 }
 0x143   :  { %552 = vmatmul.mubr.bf16.vlgmr.msra.gmra.mrb[0].mxu1 %v210_v27 }
 0x216   :  { %v316_v32 = vpop.f32.mrb[0].mxu1 }
 0x217   :  { %v317_v33 = vadd.f32 %v470_v31, %v316_v32  ;;  %v553_v34 = vpop.f32.mrb[1].mxu1 }
 0x218   :  { %v319_v35 = vpop.f32.mrb[2].mxu1 }
 0x219   :  { %v320_v36 = vadd.f32 %v470_v31, %v319_v35  ;;  %v554_v37 = vpop.f32.mrb[3].mxu1  ;;  %v323_v38 = vmax.f32 %v317_v33, 0.0 }
 0x21b   :  { %v324_v39 = vmax.f32 %v320_v36, 0.0 }
 0x21d   :  { %v325_v40 = vpack.c.bf16 %v324_v39, %v323_v38 }
 0x21f   :  { %572 = vmatmul.mubr.bf16.vlgmr.msra.gmra.mrb[4].mxu0 %v325_v40 }
 0x2f2   :  { %v431_v42 = vpop.f32.mrb[4].mxu0 }
 0x2f3   :  { %v432_v43 = vadd.f32 %v479_v41, %v431_v42  ;;  %v573_v44 = vpop.f32.mrb[5].mxu0 }
 0x2f4   :  { %v434_v45 = vpop.f32.mrb[6].mxu0 }
 0x2f5   :  { %v438_v46 = vmax.f32 %v432_v43, 0.0  ;;  %v435_v47 = vadd.f32 %v479_v41, %v434_v45  ;;  %v574_v48 = vpop.f32.mrb[7].mxu0 }
 0x2f7   :  { %440 = vst [vmem:[#allocation11] sm:$0xff] %v438_v46  ;;  %v439_v49 = vmax.f32 %v435_v47, 0.0 }
 0x2f9   :  { %441 = vst [vmem:[#allocation11 + $0x8] sm:$0xff] %v439_v49 }
 0x2fa   :  { %710 = shalt.err (!%p707_p8)
}
 0x2fb   :  { %s711_s26 = scalar_lea.hbm %s903_s6, 256 }
 0x2fc   :  { %p712_p9 = scmp.ne.s32.totalorder %s903_s6, %s711_s26  ;;  %p715_p10 = scmp.lt.u32.totalorder %s711_s26, %s903_s6 }
 0x2fe   :  { %p717_p11 = pnand %p715_p10, %p712_p9 }
 0x300   :  { %720 = shalt.err (!%p717_p11)
}
 0x301   :  { %s738_s7 = smov 128   ;;  %s739_s8 = smov 8  }
 0x302   :  { %453 = dma.vmem_to_hbm [thread:$0]  %s448_s23, 256, %s903_s6, [#allocation5], %s738_s7, %s738_s7, %s739_s8  }
 0x303   :  { %727 = dma.done.wait [#allocation5], 256  }
 0x304   :  { %728 = vsyncadd [#allocation5], 4294967040 }
 0x305   :  { %457 = vsyncpa [#allocation4], 1 }
 0x306   :  { %458 = vsyncpa [#allocation7], 1 }
 0x307   :  { %459 = vsyncpa [#allocation10], 1 }
 0x308   :  { %460 = vsyncpa [#allocation5], 1 }

</bundles_post_ra>
